<compile_context>
chip_gen: v5e
topology: v5e:2x2
jax: 0.10.0
libtpu: 0.0.40
codegen_flags: <defaults>
</compile_context>

<pallas_src>
import jax
import jax.numpy as jnp
from jax.experimental import pallas as pl
from jax.experimental.pallas import tpu as pltpu


def _min_kernel(*refs):
    """refs = (in_ref_0, ..., in_ref_{n-1}, out_ref); n is static (2 or 3)."""
    *in_refs, o_ref = refs
    acc = in_refs[0][...]
    for r in in_refs[1:]:          # fully unrolled static loop over the stack
        acc = jnp.minimum(acc, r[...])
    o_ref[...] = acc


def _pick_row_tile(rows, cols, n_inputs, itemsize,
                   vmem_budget_bytes=32 * 1024 * 1024):
    """Largest row tile (multiple of 8, dividing `rows`) under the VMEM budget."""
    # (n_inputs + 1 output) blocks, each double-buffered by the Pallas pipeline.
    bytes_per_row = (n_inputs + 1) * 2 * cols * itemsize
    max_rows = max(8, vmem_budget_bytes // max(bytes_per_row, 1))
    if rows <= max_rows:
        return rows                 # single full-height block, grid = (1,)
    for cand in (4096, 2048, 1024, 512, 256, 128, 64, 32, 16, 8):
        if cand <= max_rows and rows % cand == 0:
            return cand
    return rows                     # no aligned divisor: fall back to full


def _min_set_pallas(*embeds):
    x0 = embeds[0]
    for e in embeds[1:]:
        assert e.shape == x0.shape and e.dtype == x0.dtype
    orig_shape, dtype = x0.shape, x0.dtype
    size = x0.size

    # Lane-dense 2-D view: (rows, 128) when possible, else (leading, last_dim).
    if size % 128 == 0:
        rows, cols = size // 128, 128
    else:
        cols = orig_shape[-1]
        rows = size // cols

    n = len(embeds)
    tile_r = _pick_row_tile(rows, cols, n, jnp.dtype(dtype).itemsize)
    grid = (rows // tile_r,)        # tile_r always divides rows by construction

    spec = pl.BlockSpec((tile_r, cols), lambda i: (i, 0))
    out2d = pl.pallas_call(
        _min_kernel,
        out_shape=jax.ShapeDtypeStruct((rows, cols), dtype),
        grid_spec=pltpu.PrefetchScalarGridSpec(
            num_scalar_prefetch=0,
            grid=grid,
            in_specs=[spec] * n,
            out_specs=spec,
        ),
        compiler_params=pltpu.CompilerParams(
            dimension_semantics=("parallel",),   # independent row tiles
        ),
    )(*(e.reshape(rows, cols) for e in embeds))
    return out2d.reshape(orig_shape)


def _nonempty(x):
    if x is None:
        return False
    if isinstance(x, (list, tuple)):
        return len(x) > 0
    return x.size > 0


class MinSet:
    """JAX/Pallas port of the PyTorch MinSet module."""

    def __call__(self, embeds1, embeds1_o, embeds2, embeds2_o,
                 embeds3=None, embeds3_o=None):
        # The offset embeddings (embeds*_o) are unused by the reference forward.
        if _nonempty(embeds3):
            return _min_set_pallas(embeds1, embeds2, embeds3)
        return _min_set_pallas(embeds1, embeds2)


if __name__ == "__main__":
    key = jax.random.PRNGKey(0)
    k1, k2, k3, k4, k5, k6 = jax.random.split(key, 6)

    batch, dim = 8, 32
    embeds1 = jax.random.normal(k1, (batch, dim), jnp.float32)
    embeds2 = jax.random.normal(k2, (batch, dim), jnp.float32)
    embeds3 = jax.random.normal(k3, (batch, dim), jnp.float32)
    embeds1_o = jax.random.normal(k4, (batch, dim), jnp.float32)
    embeds2_o = jax.random.normal(k5, (batch, dim), jnp.float32)
    embeds3_o = jax.random.normal(k6, (batch, dim), jnp.float32)

    model = MinSet()

    # 2-operand min
    out2 = model(embeds1, embeds1_o, embeds2, embeds2_o)
    out2 = jax.block_until_ready(out2)

    # 3-operand min
    out3 = model(embeds1, embeds1_o, embeds2, embeds2_o, embeds3, embeds3_o)
    out3 = jax.block_until_ready(out3)

    # correctness check against a pure-JAX reference (elementwise min is exact)
    ref2 = jnp.min(jnp.stack([embeds1, embeds2], axis=0), axis=0)
    ref3 = jnp.min(jnp.stack([embeds1, embeds2, embeds3], axis=0), axis=0)

    assert out2.shape == (batch, dim)
    assert out3.shape == (batch, dim)
    assert jnp.array_equal(out2, ref2)
    assert jnp.array_equal(out3, ref3)

    print("KERNEL_OK")
</pallas_src>

<mosaic_0001>
module attributes {stable_mosaic.version = 11 : i64} {
  func.func @_min_kernel(%arg0: i32, %arg1: memref<2x128xf32, #tpu.memory_space<vmem>>, %arg2: memref<2x128xf32, #tpu.memory_space<vmem>>, %arg3: memref<2x128xf32, #tpu.memory_space<vmem>>) attributes {dimension_semantics = [#tpu.dimension_semantics<parallel>], iteration_bounds = array<i64: 1>, scalar_prefetch = 0 : i64, scratch_operands = 0 : i64, tpu.core_type = #tpu.core_type<tc>, window_params = [{transform_indices = @transform_0, window_bounds = array<i64: 2, 128>}, {transform_indices = @transform_1, window_bounds = array<i64: 2, 128>}, {transform_indices = @transform_2, window_bounds = array<i64: 2, 128>}]} {
    %c0 = arith.constant 0 : index
    %c0_0 = arith.constant 0 : index
    %0 = vector.load %arg1[%c0, %c0_0] : memref<2x128xf32, #tpu.memory_space<vmem>>, vector<2x128xf32>
    %c0_1 = arith.constant 0 : index
    %c0_2 = arith.constant 0 : index
    %1 = vector.load %arg2[%c0_1, %c0_2] : memref<2x128xf32, #tpu.memory_space<vmem>>, vector<2x128xf32>
    %2 = arith.minimumf %0, %1 : vector<2x128xf32>
    %c0_3 = arith.constant 0 : index
    %c0_4 = arith.constant 0 : index
    %3 = vector.load %arg3[%c0_3, %c0_4] : memref<2x128xf32, #tpu.memory_space<vmem>>, vector<2x128xf32>
    tpu.vector_store %arg3[%c0_3, %c0_4], %2 {strides = array<i32>} : memref<2x128xf32, #tpu.memory_space<vmem>>, vector<2x128xf32>,
    return
  }
  func.func @transform_0(%arg0: i32) -> (i32, i32) {
    %c0_i32 = arith.constant 0 : i32
    %c0_i32_0 = arith.constant 0 : i32
    return %arg0, %c0_i32 : i32, i32
  }
  func.func @transform_1(%arg0: i32) -> (i32, i32) {
    %c0_i32 = arith.constant 0 : i32
    %c0_i32_0 = arith.constant 0 : i32
    return %arg0, %c0_i32 : i32, i32
  }
  func.func @transform_2(%arg0: i32) -> (i32, i32) {
    %c0_i32 = arith.constant 0 : i32
    %c0_i32_0 = arith.constant 0 : i32
    return %arg0, %c0_i32 : i32, i32
  }
}

</mosaic_0001>

<bundles_post_ra>
// kernel: tpu_custom_call.1
= control target key start
LH: loop header
LB: loop body
LE: loop exit
PB: predicated region body
PF: predicated region fallthrough
CT: control target
= control target key end

     0   :  { %7 = vsyncpa [#allocation3], 0  ;;  %s170_s0 = inlined_call_operand.hbm [shape: f32[2,128], index: 0, kind: input, shape index: {}]   ;;  %s171_s1 = inlined_call_operand.hbm [shape: f32[2,128], index: 1, kind: input, shape index: {}]   ;;  %s172_s2 = inlined_call_operand.hbm [shape: f32[2,128], index: 2, kind: output, shape index: {}]  }
   0x1   :  { %8 = vsyncpa [#allocation6], 0 }
   0x2   :  { %9 = vsyncpa [#allocation4], 0  ;;  %s15_s11 = sshll.u32 %s170_s0, 4  ;;  %s143_s12 = smov [#allocation2]   ;;  %s16_s11 = int_to_ptr.hbm [resolvable:$true] %s15_s11 }
   0x3   :  { %s17_s13 = sshll.u32 %s143_s12, 4  ;;  %s26_s16 = sshll.u32 %s171_s1, 4  ;;  %s18_s13 = int_to_ptr.vmem [resolvable:$true] %s17_s13  ;;  %s27_s16 = int_to_ptr.hbm [resolvable:$true] %s26_s16 }
   0x4   :  { %20 = dma.hbm_to_vmem [thread:$0]  %s16_s11, 32, %s18_s13, [#allocation3]  }
   0x5   :  { %s144_s17 = smov [#allocation5]  }
   0x6   :  { %s28_s18 = sshll.u32 %s144_s17, 4  ;;  %s29_s18 = int_to_ptr.vmem [resolvable:$true] %s28_s18 }
   0x7   :  { %31 = dma.hbm_to_vmem [thread:$0]  %s27_s16, 32, %s29_s18, [#allocation6]  }
   0x8   :  { %137 = dma.done.wait [#allocation3], 32  }
   0x9   :  { %138 = vsyncadd [#allocation3], 4294967264 }
   0xa   :  { %139 = dma.done.wait [#allocation6], 32  }
   0xb   :  { %140 = vsyncadd [#allocation6], 4294967264  ;;  %s145_s19 = smov [#allocation7]   ;;  %s51_s22 = sshll.u32 %s172_s2, 4  ;;  %v40_v0 = vld [vmem:[#allocation2] sm:$0x3]  ;;  %s52_s22 = int_to_ptr.hbm [resolvable:$true] %s51_s22 }
   0xc   :  { %s49_s0 = sshll.u32 %s145_s19, 4  ;;  %v41_v1 = vld [vmem:[#allocation5] sm:$0x3]  ;;  %s50_s0 = int_to_ptr.vmem [resolvable:$true] %s49_s0 }
   0xd   :  { %v42_v2 = vmin.f32 %v40_v0, %v41_v1 }
   0xf   :  { %43 = vst [vmem:[#allocation7] sm:$0x3] %v42_v2 }
  0x10   :  { %54 = dma.vmem_to_hbm [thread:$0]  %s50_s0, 32, %s52_s22, [#allocation4]  }
  0x11   :  { %141 = dma.done.wait [#allocation4], 32  }
  0x12   :  { %142 = vsyncadd [#allocation4], 4294967264 }
  0x13   :  { %59 = vsyncpa [#allocation3], 1 }
  0x14   :  { %60 = vsyncpa [#allocation6], 1 }
  0x15   :  { %61 = vsyncpa [#allocation4], 1 }

</bundles_post_ra>
